<compile_context>
chip_gen: v5e
topology: v5e:2x2
jax: 0.10.0
libtpu: 0.0.40
codegen_flags: <defaults>
</compile_context>

<pallas_src>
import functools

import jax
import jax.numpy as jnp
import numpy as np
from jax import lax
from jax.experimental import pallas as pl
from jax.experimental.pallas import tpu as pltpu


def _round_up(x: int, m: int) -> int:
    return ((x + m - 1) // m) * m


def sdot_attn_kernel(q_ref, wq_ref, wk_ref, k_ref, vt_ref,        # inputs
                     attn_ref, ycf_ref,                           # outputs
                     kvec_ref, m_ref, l_ref, acc_ref, mhist_ref,  # scratch
                     *, inv_sqrt_dim, k_len, tile, need_mask):
    i = pl.program_id(0)

    @pl.when(i == 0)
    def _init():
        # Fused projection: score = ((q @ WQ) @ WK_w) @ key^T / sqrt(A).
        # Fold 1/sqrt(A) in here so the steady-state loop has no extra VPU multiply.
        qproj = jnp.dot(q_ref[...], wq_ref[...], preferred_element_type=jnp.float32)
        kvec_ref[...] = jnp.dot(qproj, wk_ref[...],
                                preferred_element_type=jnp.float32) * inv_sqrt_dim
        m_ref[...] = jnp.full_like(m_ref, -jnp.inf)
        l_ref[...] = jnp.zeros_like(l_ref)
        acc_ref[...] = jnp.zeros_like(acc_ref)

    # Scores for this key tile: contract the d_in axes directly (key kept in its
    # natural layout; Mosaic does the small in-VMEM transpose on the idle XLU slot).
    s = lax.dot_general(kvec_ref[...], k_ref[...],
                        dimension_numbers=(((1,), (1,)), ((), ())),
                        preferred_element_type=jnp.float32)        # (1, tile)

    if need_mask:  # static Python bool: only traced when the key length is ragged
        col = i * tile + lax.broadcasted_iota(jnp.int32, (1, tile), 1)
        s = jnp.where(col < k_len, s, -jnp.inf)

    # Online softmax. Store p = exp(s - m_running) in the resident output slab and
    # remember this tile's running max; finalize rescales each row with a single exp
    # per tile instead of re-exponentiating all K scores.
    m_prev = m_ref[...]
    m_new = jnp.maximum(m_prev, jnp.max(s, axis=1, keepdims=True))
    p = jnp.exp(s - m_new)                                         # (1, tile)
    attn_ref[pl.ds(i, 1), :] = p
    mhist_ref[pl.ds(i, 1), :] = m_new

    alpha = jnp.exp(m_prev - m_new)                                # (1, 1); step 0 -> 0
    l_ref[...] = alpha * l_ref[...] + jnp.sum(p, axis=1, keepdims=True)
    # Lane-dense value tile (v_dim, tile): sublane-broadcast p, VALU mul, XLU lane-reduce.
    acc_ref[...] = alpha * acc_ref[...] + jnp.sum(vt_ref[...] * p, axis=1, keepdims=True)
    m_ref[...] = m_new

    @pl.when(i == pl.num_programs(0) - 1)
    def _finalize():
        inv_l = 1.0 / l_ref[...]                                   # exact (tolerance)
        row_scale = jnp.exp(mhist_ref[...] - m_ref[...]) * inv_l   # (n_tiles, 1)
        attn_ref[...] = attn_ref[...] * row_scale
        ycf_ref[...] = acc_ref[...] * inv_l


def _streamed_spec(block_shape, index_map, depth):
    """Streamed-input BlockSpec; request a deeper pipeline when the API supports it."""
    if depth > 2:
        try:
            return pl.BlockSpec(block_shape, index_map, pipeline_mode=pl.Buffered(depth))
        except (AttributeError, TypeError):
            pass
    return pl.BlockSpec(block_shape, index_map)


@functools.partial(jax.jit, static_argnames=("tile_k", "buffer_depth"))
def sdot_attn(query, key, value, wq, wk, *, tile_k=1024, buffer_depth=3):
    """query:(D_in,), key:(K,D_in), value:(K,V), wq:(D_in,A)=WQ.weight.T, wk:(A,D_in)=WK.weight."""
    d_in = query.shape[0]
    k_len = key.shape[0]
    v_dim = value.shape[1]
    a_dim = wq.shape[1]

    # Key tile: large (kernel is HBM/overhead-bound), multiple of 128, clamped to the
    # 128-rounded key length. Ragged tails are zero-padded and masked in-kernel.
    tile = min(_round_up(max(tile_k, 128), 128), _round_up(k_len, 128))
    n_tiles = pl.cdiv(k_len, tile)
    k_pad = n_tiles * tile
    need_mask = k_pad != k_len

    keyf = key.astype(jnp.float32)
    valf = value.astype(jnp.float32)
    if need_mask:
        keyf = jnp.pad(keyf, ((0, k_pad - k_len), (0, 0)))
        valf = jnp.pad(valf, ((0, k_pad - k_len), (0, 0)))
    # Value transposed once (layout plumbing): key axis on the 128 lanes, so pipelined
    # value buffers are lane-dense. Key itself stays natural -> no extra HBM pass.
    val_t = jnp.transpose(valf)                              # (v_dim, k_pad)
    q2 = query.reshape(1, d_in).astype(jnp.float32)

    kernel = functools.partial(
        sdot_attn_kernel,
        inv_sqrt_dim=float(1.0 / np.sqrt(a_dim)),
        k_len=k_len, tile=tile, need_mask=need_mask)

    grid_spec = pltpu.PrefetchScalarGridSpec(
        num_scalar_prefetch=0,
        grid=(n_tiles,),
        in_specs=[
            pl.BlockSpec((1, d_in), lambda i: (0, 0)),            # query (resident)
            pl.BlockSpec((d_in, a_dim), lambda i: (0, 0)),        # WQ.weight.T (resident)
            pl.BlockSpec((a_dim, d_in), lambda i: (0, 0)),        # WK.weight (resident)
            _streamed_spec((tile, d_in), lambda i: (i, 0), buffer_depth),   # key tile
            _streamed_spec((v_dim, tile), lambda i: (0, i), buffer_depth),  # value^T tile
        ],
        out_specs=[
            pl.BlockSpec((n_tiles, tile), lambda i: (0, 0)),      # attn slab (resident)
            pl.BlockSpec((v_dim, 1), lambda i: (0, 0)),           # aggregated value
        ],
        scratch_shapes=[
            pltpu.VMEM((1, d_in), jnp.float32),     # fused (q @ WQ @ WK_w) / sqrt(A)
            pltpu.VMEM((1, 1), jnp.float32),        # running max
            pltpu.VMEM((1, 1), jnp.float32),        # running sum-exp
            pltpu.VMEM((v_dim, 1), jnp.float32),    # running weighted value
            pltpu.VMEM((n_tiles, 1), jnp.float32),  # per-tile running max (finalize)
        ],
    )

    # VMEM budget: resident attention slab (4*K bytes) + pipelined key/value buffers.
    # Raise the scoped limit only when the default would be tight (large K), keeping
    # headroom for v7x's 64 MiB physical VMEM. NOTE: for multi-million-key inputs the
    # slab should instead be streamed per tile (out index_map lambda i: (i, 0)) with
    # (m, l) emitted and the normalization done in the wrapper.
    vmem_need = (2 * n_tiles * tile * 4
                 + 3 * tile * max(d_in, 128) * 4
                 + 3 * max(v_dim, 8) * tile * 4
                 + (1 << 20))
    compiler_kwargs = dict(dimension_semantics=("arbitrary",))
    if vmem_need > (30 << 20):
        compiler_kwargs["vmem_limit_bytes"] = int(min(vmem_need + (8 << 20), 64 << 20))

    # Single softmax-reduction grid axis -> "arbitrary". (A v7x dual-TensorCore split of
    # the key range with partial (m, l, acc) merge would add a leading core-parallel axis;
    # not implemented here since v5e/v6e have a single TensorCore.)
    flops = (2 * k_pad * d_in + 2 * k_pad * v_dim + 6 * k_pad
             + 2 * d_in * a_dim + 2 * a_dim * d_in)
    bytes_accessed = 4 * (k_pad * d_in + k_pad * v_dim + 2 * d_in * a_dim
                          + d_in + k_pad + v_dim)

    attn_tiles, ycf = pl.pallas_call(
        kernel,
        out_shape=(
            jax.ShapeDtypeStruct((n_tiles, tile), jnp.float32),
            jax.ShapeDtypeStruct((v_dim, 1), jnp.float32),
        ),
        grid_spec=grid_spec,
        compiler_params=pltpu.CompilerParams(**compiler_kwargs),
        cost_estimate=pl.CostEstimate(flops=flops,
                                      transcendentals=k_pad + 2 * n_tiles,
                                      bytes_accessed=bytes_accessed),
    )(q2, wq.astype(jnp.float32), wk.astype(jnp.float32), keyf, val_t)

    attn = attn_tiles.reshape(1, k_pad)[:, :k_len]   # torch: softmax(score.view(1,-1))
    return attn, ycf.reshape(v_dim)                  # torch: (attn @ value).squeeze()


def sdot_attn_reference(query, key, value, wq, wk):
    """Pure-JAX reference mirroring the torch forward pass exactly (no fusion)."""
    a_dim = wq.shape[1]
    qproj = query @ wq                       # == WQ(query)
    kproj = key @ wk.T                       # == WK(key)   (wk stored as weight (A, D_in))
    score = (qproj[None, :] @ kproj.T) / jnp.sqrt(jnp.float32(a_dim))
    attn = jax.nn.softmax(score, axis=-1)
    aggr = (attn @ value).squeeze()
    return attn, aggr


if __name__ == "__main__":
    key0 = jax.random.PRNGKey(0)
    kq, kk, kv, kwq, kwk = jax.random.split(key0, 5)

    D_IN, A_DIM, K_LEN, V_DIM = 16, 32, 384, 8
    query = jax.random.normal(kq, (D_IN,), jnp.float32)
    key_m = jax.random.normal(kk, (K_LEN, D_IN), jnp.float32)
    value = jax.random.normal(kv, (K_LEN, V_DIM), jnp.float32)
    wq = jax.random.normal(kwq, (D_IN, A_DIM), jnp.float32) / np.sqrt(D_IN)   # = WQ.weight.T
    wk = jax.random.normal(kwk, (A_DIM, D_IN), jnp.float32) / np.sqrt(A_DIM)  # = WK.weight

    cases = [
        dict(k=K_LEN, tile_k=1024),   # default: one big lane-dense tile
        dict(k=K_LEN, tile_k=128),    # multi-tile streaming online softmax
        dict(k=300,   tile_k=128),    # ragged key length -> zero-pad + in-kernel mask
    ]
    depth = 3
    for case in cases:
        kl = case["k"]
        k_, v_ = key_m[:kl], value[:kl]
        try:
            attn, ycf = sdot_attn(query, k_, v_, wq, wk,
                                  tile_k=case["tile_k"], buffer_depth=depth)
        except Exception:
            depth = 2  # runtime without deep pipeline_mode support; fall back
            attn, ycf = sdot_attn(query, k_, v_, wq, wk,
                                  tile_k=case["tile_k"], buffer_depth=depth)
        jax.block_until_ready((attn, ycf))

        attn_ref, ycf_ref = sdot_attn_reference(query, k_, v_, wq, wk)
        np.testing.assert_allclose(np.asarray(attn), np.asarray(attn_ref),
                                   rtol=1e-4, atol=1e-6)
        np.testing.assert_allclose(np.asarray(ycf), np.asarray(ycf_ref),
                                   rtol=1e-4, atol=1e-5)
        assert attn.shape == (1, kl) and ycf.shape == (V_DIM,)
        assert abs(float(attn.sum()) - 1.0) < 1e-4

    print("KERNEL_OK")
</pallas_src>

<mosaic_0001>
module attributes {stable_mosaic.version = 11 : i64} {
  func.func @sdot_attn_kernel(%arg0: i32, %arg1: memref<1x16xf32, #tpu.memory_space<vmem>>, %arg2: memref<16x32xf32, #tpu.memory_space<vmem>>, %arg3: memref<32x16xf32, #tpu.memory_space<vmem>>, %arg4: memref<384x16xf32, #tpu.memory_space<vmem>>, %arg5: memref<8x384xf32, #tpu.memory_space<vmem>>, %arg6: memref<1x384xf32, #tpu.memory_space<vmem>>, %arg7: memref<8x1xf32, #tpu.memory_space<vmem>>, %arg8: memref<1x16xf32, #tpu.memory_space<vmem>>, %arg9: memref<1x1xf32, #tpu.memory_space<vmem>>, %arg10: memref<1x1xf32, #tpu.memory_space<vmem>>, %arg11: memref<8x1xf32, #tpu.memory_space<vmem>>, %arg12: memref<1x1xf32, #tpu.memory_space<vmem>>) attributes {dimension_semantics = [#tpu.dimension_semantics<arbitrary>], iteration_bounds = array<i64: 1>, scalar_prefetch = 0 : i64, scratch_operands = 5 : i64, tpu.core_type = #tpu.core_type<tc>, window_params = [{pipeline_mode = #tpu.pipeline_mode<synchronous>, transform_indices = @transform_0, window_bounds = array<i64: 1, 16>}, {pipeline_mode = #tpu.pipeline_mode<synchronous>, transform_indices = @transform_1, window_bounds = array<i64: 16, 32>}, {pipeline_mode = #tpu.pipeline_mode<synchronous>, transform_indices = @transform_2, window_bounds = array<i64: 32, 16>}, {transform_indices = @transform_3, window_bounds = array<i64: 384, 16>}, {transform_indices = @transform_4, window_bounds = array<i64: 8, 384>}, {pipeline_mode = #tpu.pipeline_mode<synchronous>, transform_indices = @transform_5, window_bounds = array<i64: 1, 384>}, {pipeline_mode = #tpu.pipeline_mode<synchronous>, transform_indices = @transform_6, window_bounds = array<i64: 8, 1>}]} {
    %c0_i32 = arith.constant 0 : i32
    %0 = arith.cmpi eq, %arg0, %c0_i32 : i32
    %1 = arith.extui %0 : i1 to i32
    %c0_i32_0 = arith.constant 0 : i32
    %2 = arith.cmpi ne, %1, %c0_i32_0 : i32
    scf.if %2 {
      %c0_25 = arith.constant 0 : index
      %c0_26 = arith.constant 0 : index
      %39 = vector.load %arg1[%c0_25, %c0_26] : memref<1x16xf32, #tpu.memory_space<vmem>>, vector<1x16xf32>
      %c0_27 = arith.constant 0 : index
      %c0_28 = arith.constant 0 : index
      %40 = vector.load %arg2[%c0_27, %c0_28] : memref<16x32xf32, #tpu.memory_space<vmem>>, vector<16x32xf32>
      %cst_29 = arith.constant dense<0.000000e+00> : vector<1x32xf32>
      %41 = tpu.matmul %39, %40, %cst_29 {dimension_numbers = #tpu.dot_dimension_numbers<[1], [0], [0], [1], [0, 0, 1, 1], [], []>} : vector<1x16xf32>, vector<16x32xf32>, vector<1x32xf32> -> vector<1x32xf32>
      %c0_30 = arith.constant 0 : index
      %c0_31 = arith.constant 0 : index
      %42 = vector.load %arg3[%c0_30, %c0_31] : memref<32x16xf32, #tpu.memory_space<vmem>>, vector<32x16xf32>
      %cst_32 = arith.constant dense<0.000000e+00> : vector<1x16xf32>
      %43 = tpu.matmul %41, %42, %cst_32 {dimension_numbers = #tpu.dot_dimension_numbers<[1], [0], [0], [1], [0, 0, 1, 1], [], []>} : vector<1x32xf32>, vector<32x16xf32>, vector<1x16xf32> -> vector<1x16xf32>
      %cst_33 = arith.constant 0.176776692 : f32
      %44 = vector.broadcast %cst_33 : f32 to vector<1x16xf32>
      %45 = arith.mulf %43, %44 : vector<1x16xf32>
      %c0_34 = arith.constant 0 : index
      %c0_35 = arith.constant 0 : index
      %46 = vector.load %arg8[%c0_34, %c0_35] : memref<1x16xf32, #tpu.memory_space<vmem>>, vector<1x16xf32>
      tpu.vector_store %arg8[%c0_34, %c0_35], %45 {strides = array<i32>} : memref<1x16xf32, #tpu.memory_space<vmem>>, vector<1x16xf32>,
      %cst_36 = arith.constant 0xFF800000 : f32
      %47 = vector.broadcast %cst_36 : f32 to vector<1x1xf32>
      %c0_37 = arith.constant 0 : index
      %c0_38 = arith.constant 0 : index
      %48 = vector.load %arg9[%c0_37, %c0_38] : memref<1x1xf32, #tpu.memory_space<vmem>>, vector<1x1xf32>
      tpu.vector_store %arg9[%c0_37, %c0_38], %47 {strides = array<i32>} : memref<1x1xf32, #tpu.memory_space<vmem>>, vector<1x1xf32>,
      %cst_39 = arith.constant 0.000000e+00 : f32
      %49 = vector.broadcast %cst_39 : f32 to vector<1x1xf32>
      %c0_40 = arith.constant 0 : index
      %c0_41 = arith.constant 0 : index
      %50 = vector.load %arg10[%c0_40, %c0_41] : memref<1x1xf32, #tpu.memory_space<vmem>>, vector<1x1xf32>
      tpu.vector_store %arg10[%c0_40, %c0_41], %49 {strides = array<i32>} : memref<1x1xf32, #tpu.memory_space<vmem>>, vector<1x1xf32>,
      %cst_42 = arith.constant 0.000000e+00 : f32
      %51 = vector.broadcast %cst_42 : f32 to vector<8x1xf32>
      %c0_43 = arith.constant 0 : index
      %c0_44 = arith.constant 0 : index
      %52 = vector.load %arg11[%c0_43, %c0_44] : memref<8x1xf32, #tpu.memory_space<vmem>>, vector<8x1xf32>
      tpu.vector_store %arg11[%c0_43, %c0_44], %51 {strides = array<i32>} : memref<8x1xf32, #tpu.memory_space<vmem>>, vector<8x1xf32>,
    } else {
    }
    %c0 = arith.constant 0 : index
    %c0_1 = arith.constant 0 : index
    %3 = vector.load %arg8[%c0, %c0_1] : memref<1x16xf32, #tpu.memory_space<vmem>>, vector<1x16xf32>
    %c0_2 = arith.constant 0 : index
    %c0_3 = arith.constant 0 : index
    %4 = vector.load %arg4[%c0_2, %c0_3] : memref<384x16xf32, #tpu.memory_space<vmem>>, vector<384x16xf32>
    %cst = arith.constant dense<0.000000e+00> : vector<1x384xf32>
    %5 = tpu.matmul %3, %4, %cst {dimension_numbers = #tpu.dot_dimension_numbers<[1], [1], [0], [0], [0, 0, 1, 0], [], []>} : vector<1x16xf32>, vector<384x16xf32>, vector<1x384xf32> -> vector<1x384xf32>
    %c0_4 = arith.constant 0 : index
    %c0_5 = arith.constant 0 : index
    %6 = vector.load %arg9[%c0_4, %c0_5] : memref<1x1xf32, #tpu.memory_space<vmem>>, vector<1x1xf32>
    %cst_6 = arith.constant dense<0xFF800000> : vector<1xf32>
    %7 = vector.multi_reduction <maximumf>, %5, %cst_6 [1] : vector<1x384xf32> to vector<1xf32>
    %8 = vector.shape_cast %7 : vector<1xf32> to vector<1x1xf32>
    %9 = arith.maximumf %6, %8 : vector<1x1xf32>
    %10 = vector.broadcast %9 : vector<1x1xf32> to vector<1x384xf32>
    %11 = arith.subf %5, %10 : vector<1x384xf32>
    %12 = math.exp %11 : vector<1x384xf32>
    %13 = arith.index_cast %arg0 : i32 to index
    %c0_7 = arith.constant 0 : index
    %14 = vector.load %arg6[%13, %c0_7] : memref<1x384xf32, #tpu.memory_space<vmem>>, vector<1x384xf32>
    tpu.vector_store %arg6[%13, %c0_7], %12 {strides = array<i32>} : memref<1x384xf32, #tpu.memory_space<vmem>>, vector<1x384xf32>,
    %15 = arith.index_cast %arg0 : i32 to index
    %c0_8 = arith.constant 0 : index
    %16 = vector.load %arg12[%15, %c0_8] : memref<1x1xf32, #tpu.memory_space<vmem>>, vector<1x1xf32>
    tpu.vector_store %arg12[%15, %c0_8], %9 {strides = array<i32>} : memref<1x1xf32, #tpu.memory_space<vmem>>, vector<1x1xf32>,
    %17 = arith.subf %6, %9 : vector<1x1xf32>
    %18 = math.exp %17 : vector<1x1xf32>
    %c0_9 = arith.constant 0 : index
    %c0_10 = arith.constant 0 : index
    %19 = vector.load %arg10[%c0_9, %c0_10] : memref<1x1xf32, #tpu.memory_space<vmem>>, vector<1x1xf32>
    %20 = arith.mulf %18, %19 : vector<1x1xf32>
    %cst_11 = arith.constant dense<0.000000e+00> : vector<1xf32>
    %21 = vector.multi_reduction <add>, %12, %cst_11 [1] : vector<1x384xf32> to vector<1xf32>
    %22 = vector.shape_cast %21 : vector<1xf32> to vector<1x1xf32>
    %23 = arith.addf %20, %22 : vector<1x1xf32>
    %c0_12 = arith.constant 0 : index
    %c0_13 = arith.constant 0 : index
    %24 = vector.load %arg10[%c0_12, %c0_13] : memref<1x1xf32, #tpu.memory_space<vmem>>, vector<1x1xf32>
    tpu.vector_store %arg10[%c0_12, %c0_13], %23 {strides = array<i32>} : memref<1x1xf32, #tpu.memory_space<vmem>>, vector<1x1xf32>,
    %c0_14 = arith.constant 0 : index
    %c0_15 = arith.constant 0 : index
    %25 = vector.load %arg11[%c0_14, %c0_15] : memref<8x1xf32, #tpu.memory_space<vmem>>, vector<8x1xf32>
    %26 = vector.broadcast %18 : vector<1x1xf32> to vector<8x1xf32>
    %27 = arith.mulf %26, %25 : vector<8x1xf32>
    %c0_16 = arith.constant 0 : index
    %c0_17 = arith.constant 0 : index
    %28 = vector.load %arg5[%c0_16, %c0_17] : memref<8x384xf32, #tpu.memory_space<vmem>>, vector<8x384xf32>
    %29 = vector.broadcast %12 : vector<1x384xf32> to vector<8x384xf32>
    %30 = arith.mulf %28, %29 : vector<8x384xf32>
    %cst_18 = arith.constant dense<0.000000e+00> : vector<8xf32>
    %31 = vector.multi_reduction <add>, %30, %cst_18 [1] : vector<8x384xf32> to vector<8xf32>
    %32 = vector.shape_cast %31 : vector<8xf32> to vector<8x1xf32>
    %33 = arith.addf %27, %32 : vector<8x1xf32>
    %c0_19 = arith.constant 0 : index
    %c0_20 = arith.constant 0 : index
    %34 = vector.load %arg11[%c0_19, %c0_20] : memref<8x1xf32, #tpu.memory_space<vmem>>, vector<8x1xf32>
    tpu.vector_store %arg11[%c0_19, %c0_20], %33 {strides = array<i32>} : memref<8x1xf32, #tpu.memory_space<vmem>>, vector<8x1xf32>,
    %c0_21 = arith.constant 0 : index
    %c0_22 = arith.constant 0 : index
    %35 = vector.load %arg9[%c0_21, %c0_22] : memref<1x1xf32, #tpu.memory_space<vmem>>, vector<1x1xf32>
    tpu.vector_store %arg9[%c0_21, %c0_22], %9 {strides = array<i32>} : memref<1x1xf32, #tpu.memory_space<vmem>>, vector<1x1xf32>,
    %c0_i32_23 = arith.constant 0 : i32
    %36 = arith.cmpi eq, %arg0, %c0_i32_23 : i32
    %37 = arith.extui %36 : i1 to i32
    %c0_i32_24 = arith.constant 0 : i32
    %38 = arith.cmpi ne, %37, %c0_i32_24 : i32
    scf.if %38 {
      %c0_25 = arith.constant 0 : index
      %c0_26 = arith.constant 0 : index
      %39 = vector.load %arg10[%c0_25, %c0_26] : memref<1x1xf32, #tpu.memory_space<vmem>>, vector<1x1xf32>
      %cst_27 = arith.constant 1.000000e+00 : f32
      %40 = vector.broadcast %cst_27 : f32 to vector<1x1xf32>
      %41 = arith.divf %40, %39 : vector<1x1xf32>
      %c0_28 = arith.constant 0 : index
      %c0_29 = arith.constant 0 : index
      %42 = vector.load %arg12[%c0_28, %c0_29] : memref<1x1xf32, #tpu.memory_space<vmem>>, vector<1x1xf32>
      %c0_30 = arith.constant 0 : index
      %c0_31 = arith.constant 0 : index
      %43 = vector.load %arg9[%c0_30, %c0_31] : memref<1x1xf32, #tpu.memory_space<vmem>>, vector<1x1xf32>
      %44 = arith.subf %42, %43 : vector<1x1xf32>
      %45 = math.exp %44 : vector<1x1xf32>
      %46 = arith.mulf %45, %41 : vector<1x1xf32>
      %c0_32 = arith.constant 0 : index
      %c0_33 = arith.constant 0 : index
      %47 = vector.load %arg6[%c0_32, %c0_33] : memref<1x384xf32, #tpu.memory_space<vmem>>, vector<1x384xf32>
      %48 = vector.broadcast %46 : vector<1x1xf32> to vector<1x384xf32>
      %49 = arith.mulf %47, %48 : vector<1x384xf32>
      %c0_34 = arith.constant 0 : index
      %c0_35 = arith.constant 0 : index
      %50 = vector.load %arg6[%c0_34, %c0_35] : memref<1x384xf32, #tpu.memory_space<vmem>>, vector<1x384xf32>
      tpu.vector_store %arg6[%c0_34, %c0_35], %49 {strides = array<i32>} : memref<1x384xf32, #tpu.memory_space<vmem>>, vector<1x384xf32>,
      %c0_36 = arith.constant 0 : index
      %c0_37 = arith.constant 0 : index
      %51 = vector.load %arg11[%c0_36, %c0_37] : memref<8x1xf32, #tpu.memory_space<vmem>>, vector<8x1xf32>
      %52 = vector.broadcast %41 : vector<1x1xf32> to vector<8x1xf32>
      %53 = arith.mulf %51, %52 : vector<8x1xf32>
      %c0_38 = arith.constant 0 : index
      %c0_39 = arith.constant 0 : index
      %54 = vector.load %arg7[%c0_38, %c0_39] : memref<8x1xf32, #tpu.memory_space<vmem>>, vector<8x1xf32>
      tpu.vector_store %arg7[%c0_38, %c0_39], %53 {strides = array<i32>} : memref<8x1xf32, #tpu.memory_space<vmem>>, vector<8x1xf32>,
    } else {
    }
    return
  }
  func.func @transform_0(%arg0: i32) -> (i32, i32) {
    %c0_i32 = arith.constant 0 : i32
    %c0_i32_0 = arith.constant 0 : i32
    %c0_i32_1 = arith.constant 0 : i32
    return %c0_i32, %c0_i32_0 : i32, i32
  }
  func.func @transform_1(%arg0: i32) -> (i32, i32) {
    %c0_i32 = arith.constant 0 : i32
    %c0_i32_0 = arith.constant 0 : i32
    %c0_i32_1 = arith.constant 0 : i32
    return %c0_i32, %c0_i32_0 : i32, i32
  }
  func.func @transform_2(%arg0: i32) -> (i32, i32) {
    %c0_i32 = arith.constant 0 : i32
    %c0_i32_0 = arith.constant 0 : i32
    %c0_i32_1 = arith.constant 0 : i32
    return %c0_i32, %c0_i32_0 : i32, i32
  }
  func.func @transform_3(%arg0: i32) -> (i32, i32) {
    %c0_i32 = arith.constant 0 : i32
    %c0_i32_0 = arith.constant 0 : i32
    return %arg0, %c0_i32 : i32, i32
  }
  func.func @transform_4(%arg0: i32) -> (i32, i32) {
    %c0_i32 = arith.constant 0 : i32
    %c0_i32_0 = arith.constant 0 : i32
    return %c0_i32, %arg0 : i32, i32
  }
  func.func @transform_5(%arg0: i32) -> (i32, i32) {
    %c0_i32 = arith.constant 0 : i32
    %c0_i32_0 = arith.constant 0 : i32
    %c0_i32_1 = arith.constant 0 : i32
    return %c0_i32, %c0_i32_0 : i32, i32
  }
  func.func @transform_6(%arg0: i32) -> (i32, i32) {
    %c0_i32 = arith.constant 0 : i32
    %c0_i32_0 = arith.constant 0 : i32
    %c0_i32_1 = arith.constant 0 : i32
    return %c0_i32, %c0_i32_0 : i32, i32
  }
}

</mosaic_0001>

<bundles_post_ra>
// kernel: sdot_attn.1
= control target key start
LH: loop header
LB: loop body
LE: loop exit
PB: predicated region body
PF: predicated region fallthrough
CT: control target
= control target key end

     0   :  { %vm30_vm0 = vcmask 130048   ;;  %s877_s0 = inlined_call_operand.vmem [shape: f32[1,16], index: 0, kind: input, shape index: {}]   ;;  %s878_s1 = inlined_call_operand.vmem [shape: f32[16,32], index: 1, kind: input, shape index: {}]   ;;  %s879_s2 = inlined_call_operand.vmem [shape: f32[32,16], index: 2, kind: input, shape index: {}]   ;;  %s880_s3 = inlined_call_operand.vmem [shape: f32[384,16], index: 3, kind: input, shape index: {}]   ;;  %s881_s4 = inlined_call_operand.vmem [shape: f32[8,384], index: 4, kind: input, shape index: {}]   ;;  %s882_s5 = inlined_call_operand.hbm [shape: f32[1,384], index: 5, kind: output, shape index: {0}]   ;;  %s883_s6 = inlined_call_operand.vmem [shape: f32[8,1], index: 6, kind: output, shape index: {1}]  }
   0x1   :  { %v29_v0 = vld [vmem:[%s878_s1 + $0x8] sm:$0xff]  ;;  %v28_v1 = vld [vmem:[%s878_s1] sm:$0xff]  ;;  %v57_v3 = vld [vmem:[%s879_s2 + $0x18] sm:$0xff] }
   0x2   :  { %48 = vmatpush.msra.mxu1 %v29_v0  ;;  %v27_v2 = vld [vmem:[%s877_s0] sm:$0x1] }
   0x3   :  { %12 = vsyncpa [#allocation8], 0  ;;  %v56_v4 = vld [vmem:[%s879_s2 + $0x10] sm:$0xff]  ;;  %v55_v5 = vld [vmem:[%s879_s2 + $0x8] sm:$0xff]  ;;  %vm58_vm1 = vcmask 261120   ;;  %vm83_vm2 = vcmask 122880  }
   0x4   :  { %49 = vmatpush.msra.mxu1 %v28_v1  ;;  %v54_v6 = vld [vmem:[%s879_s2] sm:$0xff]  ;;  %v106_v7 = vld [vmem:[%s880_s3 + $0x78] sm:$0xff]  ;;  %v105_v10 = vld [vmem:[%s880_s3 + $0x70] sm:$0xff]  ;;  %vm85_vm3 = vcmask 0   ;;  %v583_v59 = vmov -inf   ;;  %vm348_vm4 = vcmask 1040384  }
   0x5   :  { %486 = vmatmul.msk.f32.vlgmr.msra.gmra.mxu1 %vm30_vm0, %v27_v2  ;;  %v122_v8 = vld [vmem:[%s880_s3 + $0xf8] sm:$0xff]  ;;  %488 = vmatpush.xpose.msk.msra.mxu2 %vm30_vm0, %v106_v7  ;;  %v121_v11 = vld [vmem:[%s880_s3 + $0xf0] sm:$0xff]  ;;  %v104_v13 = vld [vmem:[%s880_s3 + $0x68] sm:$0xff]  ;;  %86 = vst.msk [vmem:[#allocation3] sm:$0x1] %vm85_vm3, %v583_v59  ;;  %vm88_vm5 = vcmask 7168  }
   0x6   :  { %74 = vmatpush.msrb.mxu1 %v57_v3  ;;  %v138_v9 = vld [vmem:[%s880_s3 + $0x178] sm:$0xff]  ;;  %505 = vmatpush.xpose.msk.msra.mxu3 %vm30_vm0, %v122_v8  ;;  %v137_v12 = vld [vmem:[%s880_s3 + $0x170] sm:$0xff]  ;;  %v120_v14 = vld [vmem:[%s880_s3 + $0xe8] sm:$0xff]  ;;  %vm378_vm6 = vcmask 1041408   ;;  %s586_s29 = smov [#allocation7]   ;;  %s473_s0 = sshll.u32 %s882_s5, 4  ;;  %s474_s0 = int_to_ptr.hbm [resolvable:$true] %s473_s0 }
   0x7   :  { %522 = vmatpush.xpose.msk.msra.mxu0 %vm30_vm0, %v138_v9  ;;  %v136_v15 = vld [vmem:[%s880_s3 + $0x168] sm:$0xff]  ;;  %v103_v16 = vld [vmem:[%s880_s3 + $0x60] sm:$0xff]  ;;  %v102_v19 = vld [vmem:[%s880_s3 + $0x58] sm:$0xff]  ;;  %s471_s30 = sshll.u32 %s586_s29, 4  ;;  %s472_s30 = int_to_ptr.vmem [resolvable:$true] %s471_s30 }
   0x8   :  { %75 = vmatpush.msrb.mxu1 %v56_v4  ;;  %v119_v17 = vld [vmem:[%s880_s3 + $0xe0] sm:$0xff]  ;;  %v118_v20 = vld [vmem:[%s880_s3 + $0xd8] sm:$0xff]  ;;  %v101_v22 = vld [vmem:[%s880_s3 + $0x50] sm:$0xff]  ;;  %v584_v4 = vmov 0  }
   0x9   :  { %489 = vmatpush.xpose.msk.msra.mxu2 %vm30_vm0, %v105_v10  ;;  %v135_v18 = vld [vmem:[%s880_s3 + $0x160] sm:$0xff]  ;;  %v134_v21 = vld [vmem:[%s880_s3 + $0x158] sm:$0xff]  ;;  %v117_v23 = vld [vmem:[%s880_s3 + $0xd0] sm:$0xff]  ;;  %543 = vset.pattern.permute.xlu0 %v584_v4 }
   0xa   :  { %76 = vmatpush.msrb.mxu1 %v55_v5  ;;  %506 = vmatpush.xpose.msk.msra.mxu3 %vm30_vm0, %v121_v11  ;;  %v133_v24 = vld [vmem:[%s880_s3 + $0x150] sm:$0xff]  ;;  %v100_v25 = vld [vmem:[%s880_s3 + $0x48] sm:$0xff]  ;;  %v99_v28 = vld [vmem:[%s880_s3 + $0x40] sm:$0xff]  ;;  %v585_v5 = vmov 0.0  }
   0xb   :  { %523 = vmatpush.xpose.msk.msra.mxu0 %vm30_vm0, %v137_v12  ;;  %v116_v26 = vld [vmem:[%s880_s3 + $0xc8] sm:$0xff]  ;;  %v115_v29 = vld [vmem:[%s880_s3 + $0xc0] sm:$0xff]  ;;  %v98_v31 = vld [vmem:[%s880_s3 + $0x38] sm:$0xff]  ;;  %544 = vset.pattern.permute.xlu2 %v584_v4  ;;  %87 = vst.msk [vmem:[#allocation4] sm:$0x1] %vm85_vm3, %v585_v5 }
   0xc   :  { %77 = vmatpush.msrb.mxu1 %v54_v6  ;;  %v132_v27 = vld [vmem:[%s880_s3 + $0x148] sm:$0xff]  ;;  %v131_v30 = vld [vmem:[%s880_s3 + $0x140] sm:$0xff]  ;;  %v114_v32 = vld [vmem:[%s880_s3 + $0xb8] sm:$0xff]  ;;  %89 = vst.msk [vmem:[#allocation5] sm:$0xff] %vm88_vm5, %v585_v5 }
   0xd   :  { %490 = vmatpush.xpose.msk.msra.mxu2 %vm30_vm0, %v104_v13  ;;  %v130_v34 = vld [vmem:[%s880_s3 + $0x138] sm:$0xff]  ;;  %v97_v35 = vld [vmem:[%s880_s3 + $0x30] sm:$0xff]  ;;  %v96_v38 = vld [vmem:[%s880_s3 + $0x28] sm:$0xff] }
   0xe   :  { %507 = vmatpush.xpose.msk.msra.mxu3 %vm30_vm0, %v120_v14  ;;  %v113_v36 = vld [vmem:[%s880_s3 + $0xb0] sm:$0xff]  ;;  %v112_v39 = vld [vmem:[%s880_s3 + $0xa8] sm:$0xff]  ;;  %v95_v41 = vld [vmem:[%s880_s3 + $0x20] sm:$0xff] }
   0xf   :  { %524 = vmatpush.xpose.msk.msra.mxu0 %vm30_vm0, %v136_v15  ;;  %v129_v37 = vld [vmem:[%s880_s3 + $0x130] sm:$0xff]  ;;  %v128_v40 = vld [vmem:[%s880_s3 + $0x128] sm:$0xff]  ;;  %v111_v42 = vld [vmem:[%s880_s3 + $0xa0] sm:$0xff] }
  0x10   :  { %v127_v43 = vld [vmem:[%s880_s3 + $0x120] sm:$0xff]  ;;  %v94_v44 = vld [vmem:[%s880_s3 + $0x18] sm:$0xff]  ;;  %v93_v47 = vld [vmem:[%s880_s3 + $0x10] sm:$0xff] }
  0x11   :  { %491 = vmatpush.xpose.msk.msra.mxu2 %vm30_vm0, %v103_v16  ;;  %v110_v45 = vld [vmem:[%s880_s3 + $0x98] sm:$0xff]  ;;  %v109_v48 = vld [vmem:[%s880_s3 + $0x90] sm:$0xff]  ;;  %v92_v50 = vld [vmem:[%s880_s3 + $0x8] sm:$0xff] }
  0x12   :  { %508 = vmatpush.xpose.msk.msra.mxu3 %vm30_vm0, %v119_v17  ;;  %v126_v46 = vld [vmem:[%s880_s3 + $0x118] sm:$0xff]  ;;  %v125_v49 = vld [vmem:[%s880_s3 + $0x110] sm:$0xff]  ;;  %v108_v51 = vld [vmem:[%s880_s3 + $0x88] sm:$0xff] }
  0x13   :  { %525 = vmatpush.xpose.msk.msra.mxu0 %vm30_vm0, %v135_v18  ;;  %v124_v52 = vld [vmem:[%s880_s3 + $0x108] sm:$0xff]  ;;  %v91_v53 = vld [vmem:[%s880_s3] sm:$0xff]  ;;  %v383_v18 = vlaneseq }
  0x14   :  { %v107_v54 = vld [vmem:[%s880_s3 + $0x80] sm:$0xff] }
  0x15   :  { %492 = vmatpush.xpose.msk.msra.mxu2 %vm30_vm0, %v102_v19  ;;  %v123_v55 = vld [vmem:[%s880_s3 + $0x100] sm:$0xff]  ;;  %vm855_vm7 = vcmp.lt.s32.totalorder %v383_v18, 384 }
  0x16   :  { %509 = vmatpush.xpose.msk.msra.mxu3 %vm30_vm0, %v118_v20  ;;  %v347_v6 = vld [vmem:[#allocation3] sm:$0x1] }
  0x17   :  { %526 = vmatpush.xpose.msk.msra.mxu0 %vm30_vm0, %v134_v21 }
  0x19   :  { %493 = vmatpush.xpose.msk.msra.mxu2 %vm30_vm0, %v101_v22 }
  0x1a   :  { %510 = vmatpush.xpose.msk.msra.mxu3 %vm30_vm0, %v117_v23 }
  0x1b   :  { %527 = vmatpush.xpose.msk.msra.mxu0 %vm30_vm0, %v133_v24 }
  0x1d   :  { %494 = vmatpush.xpose.msk.msra.mxu2 %vm30_vm0, %v100_v25 }
  0x1e   :  { %511 = vmatpush.xpose.msk.msra.mxu3 %vm30_vm0, %v116_v26  ;;  %v409_v26 = vld [vmem:[%s881_s4] sm:$0xff] }
  0x1f   :  { %528 = vmatpush.xpose.msk.msra.mxu0 %vm30_vm0, %v132_v27  ;;  %v410_v27 = vld [vmem:[%s881_s4 + $0x8] sm:$0xff] }
  0x21   :  { %495 = vmatpush.xpose.msk.msra.mxu2 %vm30_vm0, %v99_v28 }
  0x22   :  { %512 = vmatpush.xpose.msk.msra.mxu3 %vm30_vm0, %v115_v29 }
  0x23   :  { %529 = vmatpush.xpose.msk.msra.mxu0 %vm30_vm0, %v131_v30 }
  0x25   :  { %496 = vmatpush.xpose.msk.msra.mxu2 %vm30_vm0, %v98_v31 }
  0x26   :  { %513 = vmatpush.xpose.msk.msra.mxu3 %vm30_vm0, %v114_v32 }
  0x27   :  { %530 = vmatpush.xpose.msk.msra.mxu0 %vm30_vm0, %v130_v34 }
  0x29   :  { %497 = vmatpush.xpose.msk.msra.mxu2 %vm30_vm0, %v97_v35 }
  0x2a   :  { %514 = vmatpush.xpose.msk.msra.mxu3 %vm30_vm0, %v113_v36 }
  0x2b   :  { %531 = vmatpush.xpose.msk.msra.mxu0 %vm30_vm0, %v129_v37 }
  0x2d   :  { %498 = vmatpush.xpose.msk.msra.mxu2 %vm30_vm0, %v96_v38 }
  0x2e   :  { %515 = vmatpush.xpose.msk.msra.mxu3 %vm30_vm0, %v112_v39  ;;  %v411_v39 = vld [vmem:[%s881_s4 + $0x10] sm:$0xff] }
  0x2f   :  { %532 = vmatpush.xpose.msk.msra.mxu0 %vm30_vm0, %v128_v40 }
  0x31   :  { %499 = vmatpush.xpose.msk.msra.mxu2 %vm30_vm0, %v95_v41 }
  0x32   :  { %516 = vmatpush.xpose.msk.msra.mxu3 %vm30_vm0, %v111_v42 }
  0x33   :  { %533 = vmatpush.xpose.msk.msra.mxu0 %vm30_vm0, %v127_v43 }
  0x35   :  { %500 = vmatpush.xpose.msk.msra.mxu2 %vm30_vm0, %v94_v44 }
  0x36   :  { %517 = vmatpush.xpose.msk.msra.mxu3 %vm30_vm0, %v110_v45  ;;  %v393_v45 = vld [vmem:[#allocation4] sm:$0x1] }
  0x37   :  { %534 = vmatpush.xpose.msk.msra.mxu0 %vm30_vm0, %v126_v46 }
  0x39   :  { %501 = vmatpush.xpose.msk.msra.mxu2 %vm30_vm0, %v93_v47 }
  0x3a   :  { %518 = vmatpush.xpose.msk.msra.mxu3 %vm30_vm0, %v109_v48 }
  0x3b   :  { %535 = vmatpush.xpose.msk.msra.mxu0 %vm30_vm0, %v125_v49 }
  0x3d   :  { %502 = vmatpush.xpose.msk.msra.mxu2 %vm30_vm0, %v92_v50  ;;  %v404_v50 = vld [vmem:[#allocation5] sm:$0xff] }
  0x3e   :  { %519 = vmatpush.xpose.msk.msra.mxu3 %vm30_vm0, %v108_v51 }
  0x3f   :  { %536 = vmatpush.xpose.msk.msra.mxu0 %vm30_vm0, %v124_v52 }
  0x41   :  { %503 = vmatpush.xpose.msk.msra.mxu2 %vm30_vm0, %v91_v53 }
  0x42   :  { %520 = vmatpush.xpose.msk.msra.mxu3 %vm30_vm0, %v107_v54 }
  0x43   :  { %537 = vmatpush.xpose.msk.msra.mxu0 %vm30_vm0, %v123_v55 }
  0x82   :  { %v51_v33 = vpop.f32.mrf.mxu1 }
  0x83   :  { %487 = vmatmul.msk.f32.vlgmr.msrb.gmra.mxu1 %vm58_vm1, %v51_v33 }
 0x100   :  { %v79_v56 = vpop.f32.mrf.mxu1 }
 0x101   :  { %v82_v57 = vmul.f32 0.17677669, %v79_v56 }
 0x103   :  { %84 = vst.msk [vmem:[#allocation2] sm:$0x1] %vm83_vm2, %v82_v57 }
 0x10a   :  { %v90_v58 = vld [vmem:[#allocation2] sm:$0x1] }
 0x10b   :  { %504 = vmatmul.msk.f32.vlgmr.msra.gmra.mxu2 %vm30_vm0, %v90_v58  ;;  %521 = vmatmul.msk.f32.vlgmr.msra.gmra.mxu3 %vm30_vm0, %v90_v58 }
 0x10c   :  { %538 = vmatmul.msk.f32.vlgmr.msra.gmra.mxu0 %vm30_vm0, %v90_v58 }
 0x189   :  { %v344_v60 = vpop.f32.mrf.mxu0 }
 0x18a   :  { %v351_v2 = vsel %vm348_vm4, %v344_v60, -inf }
 0x18e   :  { %v304_v61 = vpop.f32.mrf.mxu2  ;;  %v324_v62 = vpop.f32.mrf.mxu3 }
 0x18f   :  { %v349_v63 = vsel %vm348_vm4, %v304_v61, -inf  ;;  %v350_v0 = vsel %vm348_vm4, %v324_v62, -inf }
 0x190   :  { %v352_v1 = vmax.f32 %v349_v63, %v350_v0 }
 0x192   :  { %v353_v3 = vmax.f32 %v352_v1, %v351_v2 }
 0x194   :  { %354 = vmax.xlane.f32.xlu0 %v353_v3 }
 0x207   :  { %v355_v7 = vpop.xlane.xlu0 %354 }
 0x208   :  { %v356_v8 = vmax.f32 %v347_v6, %v355_v7 }
 0x20a   :  { %389 = vst.msk [vmem:[#allocation6] sm:$0x1] %vm85_vm3, %v356_v8  ;;  %v390_v9 = vsub.f32 %v347_v6, %v356_v8  ;;  %359 = vperm.xlu0 %543, %v356_v8  }
 0x20b   :  { %425 = vst.msk [vmem:[#allocation3] sm:$0x1] %vm85_vm3, %v356_v8 }
 0x20c   :  { %v391_v43 = vmul.f32 1.442695, %v390_v9 }
 0x211   :  { %v445_v55 = vld [vmem:[#allocation6] sm:$0x1] }
 0x212   :  { %v446_v56 = vld [vmem:[#allocation3] sm:$0x1] }
 0x213   :  { %v447_v57 = vsub.f32 %v445_v55, %v446_v56 }
 0x215   :  { %v448_v59 = vmul.f32 1.442695, %v447_v57 }
 0x27c   :  { %v360_v10 = vpop.permute.xlu0 %359 }
 0x27d   :  { %v362_v11 = vperm.slane %v360_v10, 0 }
 0x27f   :  { %v363_v12 = vsub.f32 %v304_v61, %v362_v11  ;;  %v364_v13 = vsub.f32 %v324_v62, %v362_v11  ;;  %v365_v14 = vsub.f32 %v344_v60, %v362_v11 }
 0x281   :  { %v366_v15 = vmul.f32 1.442695, %v363_v12  ;;  %v368_v16 = vmul.f32 1.442695, %v364_v13  ;;  %v370_v17 = vmul.f32 1.442695, %v365_v14 }
 0x283   :  { %545 = vpow2.f32 %v366_v15 }
 0x284   :  { %547 = vpow2.f32 %v368_v16 }
 0x285   :  { %549 = vpow2.f32 %v370_v17 }
 0x286   :  { %551 = vpow2.f32 %v391_v43 }
 0x289   :  { %v546_v19 = vpop.eup %545 }
 0x28a   :  { %v548_v20 = vpop.eup %547  ;;  %v395_v21 = vsel %vm348_vm4, %v546_v19, 0.0  ;;  %v412_v22 = vperm.slane %v546_v19, 0 }
 0x28b   :  { %v550_v23 = vpop.eup %549  ;;  %v375_v24 = vrot.slane %v548_v20, 7  ;;  %v396_v25 = vsel %vm348_vm4, %v548_v20, 0.0  ;;  %v413_v28 = vperm.slane %v548_v20, 0 }
 0x28c   :  { %v376_v30 = vrot.slane %v550_v23, 6  ;;  %v397_v31 = vadd.f32 %v396_v25, %v395_v21  ;;  %v398_v33 = vsel %vm348_vm4, %v550_v23, 0.0  ;;  %v415_v36 = vmul.f32 %v412_v22, %v409_v26  ;;  %v552_v44 = vpop.eup %551 }
 0x28d   :  { %v377_v32 = vsel %vm348_vm4, %v546_v19, %v375_v24  ;;  %v416_v37 = vmul.f32 %v413_v28, %v410_v27  ;;  %v414_v38 = vperm.slane %v550_v23, 0  ;;  %v394_v46 = vmul.f32 %v552_v44, %v393_v45 }
 0x28e   :  { %v379_v34 = vsel %vm378_vm6, %v377_v32, %v376_v30  ;;  %v399_v35 = vadd.f32 %v398_v33, %v397_v31  ;;  %v406_v49 = vperm.slane %v552_v44, 0 }
 0x28f   :  { %387 = vst.msk [vmem:[#allocation7] sm:$0x7] %vm855_vm7, %v379_v34  ;;  %v418_v40 = vadd.f32 %v416_v37, %v415_v36  ;;  %v417_v41 = vmul.f32 %v414_v38, %v411_v39 }
 0x290   :  { %400 = vadd.xlane.f32.xlu1 %v399_v35  ;;  %v408_v51 = vmul.f32 %v406_v49, %v404_v50 }
 0x291   :  { %v419_v42 = vadd.f32 %v418_v40, %v417_v41 }
 0x296   :  { %v451_v12 = vld [vmem:[#allocation7] sm:$0x7] }
 0x298   :  { %420 = vadd.xlane.f32.xlu1 %v419_v42 }
 0x303   :  { %v401_v47 = vpop.xlane.xlu1 %400 }
 0x304   :  { %v402_v48 = vadd.f32 %v401_v47, %v394_v46 }
 0x306   :  { %403 = vst.msk [vmem:[#allocation4] sm:$0x1] %vm85_vm3, %v402_v48 }
 0x30b   :  { %v421_v52 = vpop.xlane.xlu1 %420 }
 0x30c   :  { %v422_v53 = vadd.f32 %v421_v52, %v408_v51 }
 0x30d   :  { %v429_v54 = vld [vmem:[#allocation4] sm:$0x1] }
 0x30e   :  { %424 = vst.msk [vmem:[#allocation5] sm:$0xff] %vm88_vm5, %v422_v53  ;;  %553 = vrcp.f32 %v429_v54  ;;  %v441_v62 = vand.u32 2147483648, %v429_v54  ;;  %v439_v0 = vand.u32 2147483647, %v429_v54  ;;  %vm435_vm9 = vweird.f32 %v429_v54 }
 0x30f   :  { %555 = vpow2.f32 %v448_v59 }
 0x310   :  { %v442_v2 = vor.u32 1.1754944e-38, %v441_v62  ;;  %vm440_vm11 = vcmp.eq.f32.partialorder %v439_v0, 8.507059e+37 }
 0x314   :  { %v554_v58 = vpop.eup %553 }
 0x315   :  { %v431_v60 = vmul.f32 %v554_v58, %v429_v54  ;;  %vm436_vm8 = vweird.f32 %v554_v58  ;;  %v556_v4 = vpop.eup %555  ;;  %v460_v8 = vld [vmem:[#allocation5] sm:$0xff] }
 0x316   :  { %vm437_vm10 = vmor %vm435_vm9, %vm436_vm8 }
 0x317   :  { %v432_v61 = vsub.f32 1.0, %v431_v60 }
 0x319   :  { %v433_v63 = vmul.f32 %v554_v58, %v432_v61 }
 0x31b   :  { %v434_v1 = vadd.f32 %v554_v58, %v433_v63 }
 0x31d   :  { %v438_v3 = vsel %vm437_vm10, %v554_v58, %v434_v1 }
 0x31e   :  { %v443_v5 = vsel %vm440_vm11, %v442_v2, %v438_v3 }
 0x31f   :  { %v450_v6 = vmul.f32 %v556_v4, %v443_v5  ;;  %v462_v7 = vperm.slane %v443_v5, 0 }
 0x321   :  { %v464_v9 = vmul.f32 %v462_v7, %v460_v8  ;;  %454 = vperm.xlu2 %544, %v450_v6  }
 0x323   :  { %465 = vst.msk [vmem:[%s883_s6] sm:$0xff] %vm88_vm5, %v464_v9 }
 0x37b   :  { %v455_v10 = vpop.permute.xlu2 %454 }
 0x37c   :  { %v457_v11 = vperm.slane %v455_v10, 0 }
 0x37e   :  { %v458_v13 = vmul.f32 %v457_v11, %v451_v12 }
 0x380   :  { %459 = vst.msk [vmem:[#allocation7] sm:$0x7] %vm855_vm7, %v458_v13 }
 0x381   :  { %476 = dma.vmem_to_hbm [thread:$0]  %s472_s30, 48, %s474_s0, [#allocation8]  }
 0x382   :  { %581 = dma.done.wait [#allocation8], 48  }
 0x383   :  { %582 = vsyncadd [#allocation8], 4294967248 }
 0x384   :  { %485 = vsyncpa [#allocation8], 1 }

</bundles_post_ra>
